<compile_context>
chip_gen: v5e
topology: v5e:2x2
jax: 0.10.0
libtpu: 0.0.40
codegen_flags: <defaults>
</compile_context>

<pallas_src>
import functools
import math

import jax
import jax.numpy as jnp
from jax.experimental import pallas as pl
from jax.experimental.pallas import tpu as pltpu


def _rmsnorm_kernel(x_ref, w_ref, o_ref, *, eps: float, inv_hidden: float):
    # x_ref: (TILE_ROWS, HIDDEN), w_ref: (1, HIDDEN) f32, o_ref: (TILE_ROWS, HIDDEN)
    x = x_ref[...].astype(jnp.float32)
    # Cross-lane reduce on the XLU; fold 1/hidden into the rsqrt argument so
    # the VPU does no extra per-element work.  rsqrt runs on the EUP.
    sum_sq = jnp.sum(x * x, axis=-1, keepdims=True)
    inv_rms = jax.lax.rsqrt(sum_sq * inv_hidden + eps)
    o_ref[...] = (x * inv_rms * w_ref[...]).astype(o_ref.dtype)


def _sublane_unit(dtype) -> int:
    # Rows per vreg sublane pack: 8 for 4-byte, 16 for 2-byte, 32 for 1-byte.
    return max(8, 32 // jnp.dtype(dtype).itemsize)


def _tpu_budgets() -> tuple[int, int, int]:
    """Generation-aware (vmem_budget_bytes, vmem_limit_bytes, min_blocks)."""
    mib = 1024 * 1024
    vmem_cap = None
    try:
        vmem_cap = int(pltpu.get_tpu_info().vmem_capacity_bytes)
    except Exception:
        vmem_cap = None
    if vmem_cap is None or vmem_cap <= 0:
        # Unknown: assume the smallest physical VMEM (v7x per-TC = 64 MiB).
        vmem_cap = 64 * mib

    if vmem_cap <= 96 * mib:
        # v7x-class: 64 MiB per TC, 2 TCs/chip.  Leave ~16 MiB Mosaic headroom
        # and ask for >=4 blocks so each TC has >=2 for pipeline overlap.
        budget = min(44 * mib, (vmem_cap * 11) // 16)
        limit = min(48 * mib, (vmem_cap * 3) // 4)
        min_blocks = 4
    else:
        # v5e/v6e-class: 128 MiB physical, single TC.  Only need 2-3 blocks of
        # pipeline depth; use the big VMEM for bigger, more efficient DMAs.
        budget = (vmem_cap * 5) // 8      # ~80 MiB on 128 MiB parts
        limit = (vmem_cap * 7) // 8       # ~112 MiB, above 16/32 MiB defaults
        min_blocks = 2
    return int(budget), int(limit), int(min_blocks)


def _pick_tile_rows(rows: int, hidden: int, dtype,
                    vmem_budget_bytes: int, min_blocks: int) -> int:
    sublane = _sublane_unit(dtype)
    itemsize = jnp.dtype(dtype).itemsize

    # Per row of a block: double-buffered input + double-buffered output
    # + f32 temporaries (no upcast copy needed for 4-byte inputs).
    temp_per_elem = 4 if itemsize >= 4 else 8
    per_row = hidden * (2 * itemsize + 2 * itemsize + temp_per_elem)

    # Largest tile that fits the VMEM budget.
    tile_rows = max(sublane, vmem_budget_bytes // max(per_row, 1))

    # Size blocks by bytes, not rows: keep each input block around
    # [2 MiB, budget/6] so DMAs sit at/above the measured roofline knee
    # without a single block starving the pipeline.
    bytes_per_row_in = max(hidden * itemsize, 1)
    target_block_bytes = max(2 * 1024 * 1024, vmem_budget_bytes // 6)
    tile_rows = min(tile_rows, max(sublane, target_block_bytes // bytes_per_row_in))

    # Don't exceed the (rounded-up) problem size.
    tile_rows = min(tile_rows, pl.cdiv(rows, sublane) * sublane)

    # Ensure at least min_blocks grid steps when the problem is big enough
    # (pipeline depth; dual-TC utilization on v7x).  Only shrink if needed.
    if rows >= min_blocks * sublane and pl.cdiv(rows, tile_rows) < min_blocks:
        cap = max(sublane, ((rows // min_blocks) // sublane) * sublane)
        tile_rows = min(tile_rows, cap)

    # Round down to the sublane packing unit.
    tile_rows = max(sublane, (tile_rows // sublane) * sublane)
    return int(tile_rows)


def rmsnorm(x: jax.Array, weight: jax.Array, eps: float = 1e-5,
            tile_rows: int | None = None) -> jax.Array:
    """RMSNorm over the last axis of x. weight has shape (hidden,)."""
    orig_shape = x.shape
    hidden = orig_shape[-1]
    assert weight.shape == (hidden,)
    # NOTE: hidden % 128 == 0 gives lane-dense (unmasked) stores.  Other sizes
    # still compile/run correctly (block spans the full dim) but are slower.

    rows = math.prod(orig_shape[:-1]) if len(orig_shape) > 1 else 1
    x2d = x.reshape(rows, hidden)
    # Pre-cast weight to f32 once in the wrapper; the (1, hidden) block is
    # grid-invariant so it stays VMEM-resident with no per-step cast.
    w2d = weight.astype(jnp.float32).reshape(1, hidden)

    vmem_budget_bytes, vmem_limit_bytes, min_blocks = _tpu_budgets()
    if tile_rows is None:
        tile_rows = _pick_tile_rows(rows, hidden, x.dtype,
                                    vmem_budget_bytes, min_blocks)

    grid = (pl.cdiv(rows, tile_rows),)   # partial last block masked by Pallas

    kernel = functools.partial(_rmsnorm_kernel, eps=float(eps),
                               inv_hidden=1.0 / float(hidden))

    itemsize = jnp.dtype(x.dtype).itemsize
    cost = pl.CostEstimate(
        flops=3 * rows * hidden,
        transcendentals=rows,
        bytes_accessed=2 * rows * hidden * itemsize + hidden * 4,
    )

    out2d = pl.pallas_call(
        kernel,
        out_shape=jax.ShapeDtypeStruct((rows, hidden), x.dtype),
        grid_spec=pltpu.PrefetchScalarGridSpec(
            num_scalar_prefetch=0,
            grid=grid,
            in_specs=[
                pl.BlockSpec((tile_rows, hidden), lambda i: (i, 0)),
                # grid-invariant weight: constant block index -> stays resident
                pl.BlockSpec((1, hidden), lambda i: (0, 0)),
            ],
            out_specs=pl.BlockSpec((tile_rows, hidden), lambda i: (i, 0)),
        ),
        compiler_params=pltpu.CompilerParams(
            dimension_semantics=("parallel",),
            vmem_limit_bytes=vmem_limit_bytes,
        ),
        cost_estimate=cost,
    )(x2d, w2d)

    return out2d.reshape(orig_shape)


def rmsnorm_ref(x, weight, eps=1e-5):
    xf = x.astype(jnp.float32)
    norm_x = jnp.mean(xf * xf, axis=-1, keepdims=True)
    x_normed = xf * jax.lax.rsqrt(norm_x + eps)
    return (weight.astype(jnp.float32) * x_normed).astype(x.dtype)


if __name__ == "__main__":
    key = jax.random.PRNGKey(0)

    # Primary test: f32, module defaults (eps=1e-5, ones weight).
    batch, seq, hidden = 2, 8, 128
    x = jax.random.normal(key, (batch, seq, hidden), dtype=jnp.float32)
    weight = jnp.ones((hidden,), dtype=jnp.float32)

    out = rmsnorm(x, weight, eps=1e-5)
    out = jax.block_until_ready(out)
    ref = rmsnorm_ref(x, weight, eps=1e-5)
    assert out.shape == x.shape
    assert jnp.allclose(out, ref, atol=1e-5, rtol=1e-5), "f32 mismatch vs reference"

    # Secondary test: bf16 input, row count that does not divide the tile
    # (exercises the masked partial-block store path, no wrapper padding).
    k2 = jax.random.PRNGKey(0)
    x2 = jax.random.normal(k2, (3, 5, 256), dtype=jnp.bfloat16)
    w2 = jnp.ones((256,), dtype=jnp.float32)
    out2 = jax.block_until_ready(rmsnorm(x2, w2, eps=1e-5, tile_rows=8))
    ref2 = rmsnorm_ref(x2, w2, eps=1e-5)
    assert out2.shape == x2.shape
    assert jnp.allclose(out2.astype(jnp.float32), ref2.astype(jnp.float32),
                        atol=2e-2, rtol=2e-2), "bf16 mismatch vs reference"

    print("KERNEL_OK")
</pallas_src>

<mosaic_0001>
module attributes {stable_mosaic.version = 11 : i64} {
  func.func @_rmsnorm_kernel(%arg0: i32, %arg1: memref<16x128xf32, #tpu.memory_space<vmem>>, %arg2: memref<1x128xf32, #tpu.memory_space<vmem>>, %arg3: memref<16x128xf32, #tpu.memory_space<vmem>>) attributes {dimension_semantics = [#tpu.dimension_semantics<parallel>], iteration_bounds = array<i64: 1>, scalar_prefetch = 0 : i64, scratch_operands = 0 : i64, tpu.core_type = #tpu.core_type<tc>, window_params = [{transform_indices = @transform_0, window_bounds = array<i64: 16, 128>}, {pipeline_mode = #tpu.pipeline_mode<synchronous>, transform_indices = @transform_1, window_bounds = array<i64: 1, 128>}, {transform_indices = @transform_2, window_bounds = array<i64: 16, 128>}]} {
    %c0 = arith.constant 0 : index
    %c0_0 = arith.constant 0 : index
    %0 = vector.load %arg1[%c0, %c0_0] : memref<16x128xf32, #tpu.memory_space<vmem>>, vector<16x128xf32>
    %1 = arith.mulf %0, %0 : vector<16x128xf32>
    %cst = arith.constant dense<0.000000e+00> : vector<16xf32>
    %2 = vector.multi_reduction <add>, %1, %cst [1] : vector<16x128xf32> to vector<16xf32>
    %3 = vector.shape_cast %2 : vector<16xf32> to vector<16x1xf32>
    %cst_1 = arith.constant 7.812500e-03 : f32
    %4 = vector.broadcast %cst_1 : f32 to vector<16x1xf32>
    %5 = arith.mulf %3, %4 : vector<16x1xf32>
    %cst_2 = arith.constant 9.99999974E-6 : f32
    %6 = vector.broadcast %cst_2 : f32 to vector<16x1xf32>
    %7 = arith.addf %5, %6 : vector<16x1xf32>
    %8 = math.rsqrt %7 : vector<16x1xf32>
    %9 = vector.broadcast %8 : vector<16x1xf32> to vector<16x128xf32>
    %10 = arith.mulf %0, %9 : vector<16x128xf32>
    %c0_3 = arith.constant 0 : index
    %c0_4 = arith.constant 0 : index
    %11 = vector.load %arg2[%c0_3, %c0_4] : memref<1x128xf32, #tpu.memory_space<vmem>>, vector<1x128xf32>
    %12 = vector.broadcast %11 : vector<1x128xf32> to vector<16x128xf32>
    %13 = arith.mulf %10, %12 : vector<16x128xf32>
    %c0_5 = arith.constant 0 : index
    %c0_6 = arith.constant 0 : index
    %14 = vector.load %arg3[%c0_5, %c0_6] : memref<16x128xf32, #tpu.memory_space<vmem>>, vector<16x128xf32>
    tpu.vector_store %arg3[%c0_5, %c0_6], %13 {strides = array<i32>} : memref<16x128xf32, #tpu.memory_space<vmem>>, vector<16x128xf32>,
    return
  }
  func.func @transform_0(%arg0: i32) -> (i32, i32) {
    %c0_i32 = arith.constant 0 : i32
    %c0_i32_0 = arith.constant 0 : i32
    return %arg0, %c0_i32 : i32, i32
  }
  func.func @transform_1(%arg0: i32) -> (i32, i32) {
    %c0_i32 = arith.constant 0 : i32
    %c0_i32_0 = arith.constant 0 : i32
    %c0_i32_1 = arith.constant 0 : i32
    return %c0_i32, %c0_i32_0 : i32, i32
  }
  func.func @transform_2(%arg0: i32) -> (i32, i32) {
    %c0_i32 = arith.constant 0 : i32
    %c0_i32_0 = arith.constant 0 : i32
    return %arg0, %c0_i32 : i32, i32
  }
}

</mosaic_0001>

<bundles_post_ra>
// kernel: tpu_custom_call.1
= control target key start
LH: loop header
LB: loop body
LE: loop exit
PB: predicated region body
PF: predicated region fallthrough
CT: control target
= control target key end

     0   :  { %7 = vsyncpa [#allocation3], 0  ;;  %s227_s0 = inlined_call_operand.hbm [shape: f32[16,128], index: 0, kind: input, shape index: {}]   ;;  %s228_s1 = inlined_call_operand.hbm [shape: f32[1,128], index: 1, kind: input, shape index: {}]   ;;  %s229_s2 = inlined_call_operand.hbm [shape: f32[16,128], index: 2, kind: output, shape index: {}]  }
   0x1   :  { %8 = vsyncpa [#allocation6], 0 }
   0x2   :  { %9 = vsyncpa [#allocation4], 0  ;;  %s14_s11 = sshll.u32 %s227_s0, 4  ;;  %s192_s12 = smov [#allocation2]   ;;  %s15_s11 = int_to_ptr.hbm [resolvable:$true] %s14_s11 }
   0x3   :  { %s16_s13 = sshll.u32 %s192_s12, 4  ;;  %s28_s16 = sshll.u32 %s228_s1, 4  ;;  %s17_s13 = int_to_ptr.vmem [resolvable:$true] %s16_s13  ;;  %s29_s16 = int_to_ptr.hbm [resolvable:$true] %s28_s16 }
   0x4   :  { %s193_s17 = smov 128   ;;  %s194_s18 = smov 8  }
   0x5   :  { %22 = dma.hbm_to_vmem [thread:$0]  %s15_s11, 256, %s17_s13, [#allocation3], %s193_s17, %s193_s17, %s194_s18  }
   0x6   :  { %s195_s19 = smov [#allocation5]  }
   0x7   :  { %s30_s20 = sshll.u32 %s195_s19, 4  ;;  %s31_s20 = int_to_ptr.vmem [resolvable:$true] %s30_s20 }
   0x8   :  { %33 = dma.hbm_to_vmem [thread:$0]  %s29_s16, 16, %s31_s20, [#allocation6]  }
   0x9   :  { %186 = dma.done.wait [#allocation3], 256  }
   0xa   :  { %187 = vsyncadd [#allocation3], 4294967040 }
   0xb   :  { %188 = dma.done.wait [#allocation6], 16  }
   0xc   :  { %189 = vsyncadd [#allocation6], 4294967280  ;;  %v42_v0 = vld [vmem:[#allocation2] sm:$0xff]  ;;  %v43_v2 = vld [vmem:[#allocation2 + $0x8] sm:$0xff]  ;;  %s196_s0 = smov [#allocation7]   ;;  %s90_s23 = sshll.u32 %s229_s2, 4  ;;  %s91_s23 = int_to_ptr.hbm [resolvable:$true] %s90_s23 }
   0xd   :  { %v44_v1 = vmul.f32 %v42_v0, %v42_v0  ;;  %v45_v3 = vmul.f32 %v43_v2, %v43_v2  ;;  %v109_v18 = vld [vmem:[#allocation5] ss:$0 sm:$0xff]  ;;  %s88_s1 = sshll.u32 %s196_s0, 4  ;;  %s89_s1 = int_to_ptr.vmem [resolvable:$true] %s88_s1 }
   0xf   :  { %46 = vadd.xlane.f32.xlu0 %v44_v1 }
  0x17   :  { %48 = vadd.xlane.f32.xlu0 %v45_v3 }
  0x82   :  { %v47_v4 = vpop.xlane.xlu0 %46 }
  0x83   :  { %v50_v5 = vmul.f32 0.0078125, %v47_v4 }
  0x85   :  { %v52_v6 = vadd.f32 1e-05, %v50_v5 }
  0x87   :  { %110 = vrsqrt.f32 %v52_v6  ;;  %vm60_vm1 = vweird.f32 %v52_v6 }
  0x8a   :  { %v49_v7 = vpop.xlane.xlu0 %48 }
  0x8b   :  { %v51_v8 = vmul.f32 0.0078125, %v49_v7 }
  0x8d   :  { %v111_v9 = vpop.eup %110  ;;  %v53_v10 = vadd.f32 1e-05, %v51_v8 }
  0x8e   :  { %v55_v11 = vmul.f32 %v111_v9, %v52_v6  ;;  %vm61_vm0 = vweird.f32 %v111_v9 }
  0x8f   :  { %112 = vrsqrt.f32 %v53_v10  ;;  %vm62_vm2 = vmor %vm60_vm1, %vm61_vm0  ;;  %vm70_vm4 = vweird.f32 %v53_v10 }
  0x90   :  { %v56_v12 = vmul.f32 %v111_v9, %v55_v11 }
  0x92   :  { %v57_v13 = vmul.f32 0.5, %v56_v12 }
  0x94   :  { %v58_v14 = vsub.f32 1.5, %v57_v13 }
  0x95   :  { %v113_v15 = vpop.eup %112 }
  0x96   :  { %v59_v16 = vmul.f32 %v111_v9, %v58_v14  ;;  %v65_v17 = vmul.f32 %v113_v15, %v53_v10  ;;  %vm71_vm3 = vweird.f32 %v113_v15 }
  0x97   :  { %vm72_vm5 = vmor %vm70_vm4, %vm71_vm3 }
  0x98   :  { %v63_v19 = vsel %vm62_vm2, %v111_v9, %v59_v16  ;;  %v66_v20 = vmul.f32 %v113_v15, %v65_v17 }
  0x99   :  { %v74_v21 = vmul.f32 %v63_v19, %v42_v0 }
  0x9a   :  { %v67_v22 = vmul.f32 0.5, %v66_v20 }
  0x9b   :  { %v80_v23 = vmul.f32 %v109_v18, %v74_v21 }
  0x9c   :  { %v68_v24 = vsub.f32 1.5, %v67_v22 }
  0x9d   :  { %82 = vst [vmem:[#allocation7] sm:$0xff] %v80_v23 }
  0x9e   :  { %v69_v25 = vmul.f32 %v113_v15, %v68_v24 }
  0xa0   :  { %v73_v26 = vsel %vm72_vm5, %v113_v15, %v69_v25 }
  0xa1   :  { %v75_v27 = vmul.f32 %v73_v26, %v43_v2 }
  0xa3   :  { %v81_v28 = vmul.f32 %v109_v18, %v75_v27 }
  0xa5   :  { %83 = vst [vmem:[#allocation7 + $0x8] sm:$0xff] %v81_v28 }
  0xa6   :  { %96 = dma.vmem_to_hbm [thread:$0]  %s89_s1, 256, %s91_s23, [#allocation4], %s193_s17, %s193_s17, %s194_s18  }
  0xa7   :  { %190 = dma.done.wait [#allocation4], 256  }
  0xa8   :  { %191 = vsyncadd [#allocation4], 4294967040 }
  0xa9   :  { %101 = vsyncpa [#allocation3], 1 }
  0xaa   :  { %102 = vsyncpa [#allocation6], 1 }
  0xab   :  { %103 = vsyncpa [#allocation4], 1 }

</bundles_post_ra>
